<compile_context>
chip_gen: v7x
topology: tpu7x:2x2x1
jax: 0.10.0
libtpu: 0.0.40
codegen_flags: <defaults>
</compile_context>

<pallas_src>
import functools

import jax
import jax.numpy as jnp
from jax.experimental import pallas as pl
from jax.experimental.pallas import tpu as pltpu

_BN_EPS = 1e-5


def _residual_cnn_batch_kernel(x_ref, mask_ref, bn_ref, w1_ref, w2_ref,
                               out_ref, patch_ref, *, cp, f, t, k, bb):
    """One grid step: bb batch elements packed into the lane axis.

    x_ref:    (C_pad, bb*F*T)  input slab (channels-major, lane-dense)
    mask_ref: (K*K,  bb*F*T)   0/1 conv boundary masks (tiled per batch elem)
    bn_ref:   (C_pad, 3)       columns = [s1, t1, t2] folded BatchNorm params
    w1_ref:   (C_pad, K*K*C_pad) bf16, norm2 scale folded into rows
    w2_ref:   (C_pad, K*K*C_pad) bf16
    patch_ref:(K*K*C_pad, bb*F*T) bf16 im2col scratch
    """
    ft = f * t
    n = bb * ft
    p = k // 2
    # Flattened-lane shift for each conv tap (static Python ints).
    shifts = [(kh - p) * t + (kw - p) for kh in range(k) for kw in range(k)]

    # Loop-invariant loads, once per grid step.
    x = x_ref[...].astype(jnp.float32)        # (C_pad, bb*F*T)
    mask = mask_ref[...]                      # (K*K,  bb*F*T) f32
    s1 = bn_ref[:, 0:1]                       # (C_pad, 1)
    t1 = bn_ref[:, 1:2]
    t2 = bn_ref[:, 2:3]
    w1m = w1_ref[...]                         # (C_pad, K*K*C_pad) bf16
    w2m = w2_ref[...]

    def im2col(h):
        # h: (C_pad, bb*F*T) f32 -> writes (K*K*C_pad, bb*F*T) bf16 patch.
        for tap, s in enumerate(shifts):
            if s == 0:
                patch_ref[tap * cp:(tap + 1) * cp, :] = h.astype(patch_ref.dtype)
            else:
                sh = pltpu.roll(h, shift=(-s) % n, axis=1)
                patch_ref[tap * cp:(tap + 1) * cp, :] = (
                    sh * mask[tap:tap + 1, :]).astype(patch_ref.dtype)

    # norm1 + relu  (dropout1: identity in eval mode)
    h = jnp.maximum(x * s1 + t1, 0.0)
    im2col(h)
    # cnn1 on the MXU; norm2's scale is pre-folded into w1m's output rows.
    y = jnp.dot(w1m, patch_ref[...], preferred_element_type=jnp.float32)
    # norm2 shift + relu  (dropout2: identity in eval mode)
    h = jnp.maximum(y + t2, 0.0)
    im2col(h)
    # cnn2 on the MXU.
    y = jnp.dot(w2m, patch_ref[...], preferred_element_type=jnp.float32)
    # residual add
    out_ref[...] = (y + x).astype(out_ref.dtype)


def residual_cnn_batch_forward(x, gamma1, beta1, mean1, var1,
                               gamma2, beta2, mean2, var2, w1, w2,
                               *, block_b=8):
    """Eval-mode forward of ResidualCNNbatch.

    x: (B, C, n_feats, time); w1/w2: (C, C, K, K) OIHW, bias-free, stride 1,
    padding K//2; gamma/beta/mean/var: per-channel BatchNorm affine params and
    running statistics, shape (C,).
    """
    B, C, F, T = x.shape
    c_out, c_in, K, K2 = w1.shape
    assert c_in == C and c_out == C and K == K2 and K % 2 == 1
    assert w2.shape == (C, C, K, K)
    p = K // 2
    FT = F * T
    assert FT % 128 == 0, "lane-dense layout requires n_feats*time % 128 == 0"
    f32 = jnp.float32

    # Pad channels to the bf16 sublane tile (16): aligned full-tile patch
    # stores and full vreg occupancy for BN/ReLU.
    CP = ((C + 15) // 16) * 16

    # Fold eval-mode BatchNorm into per-channel scale/shift.
    inv1 = jax.lax.rsqrt(var1.astype(f32) + _BN_EPS)
    inv2 = jax.lax.rsqrt(var2.astype(f32) + _BN_EPS)
    s1 = gamma1.astype(f32) * inv1
    t1 = beta1.astype(f32) - mean1.astype(f32) * s1
    s2 = gamma2.astype(f32) * inv2
    t2 = beta2.astype(f32) - mean2.astype(f32) * s2

    # Packed BN params: columns [s1, t1, t2]; padded channels stay 0 so padded
    # activations/outputs remain exactly zero.
    bn = jnp.zeros((CP, 3), f32)
    bn = bn.at[:C, 0].set(s1).at[:C, 1].set(t1).at[:C, 2].set(t2)

    # OIHW -> (C_pad, K*K*C_pad) matmul form; column order (kh, kw, ci) matches
    # im2col rows. norm2's scale s2 is folded into w1's output-channel rows.
    w1p = jnp.zeros((CP, CP, K, K), f32).at[:C, :C].set(
        w1.astype(f32) * s2.reshape(C, 1, 1, 1))
    w2p = jnp.zeros((CP, CP, K, K), f32).at[:C, :C].set(w2.astype(f32))
    w1m = jnp.transpose(w1p, (0, 2, 3, 1)).reshape(CP, K * K * CP).astype(jnp.bfloat16)
    w2m = jnp.transpose(w2p, (0, 2, 3, 1)).reshape(CP, K * K * CP).astype(jnp.bfloat16)

    # Per-tap 0/1 validity masks on the flattened (f, t) lane axis. These also
    # zero every position where pltpu.roll wraps across a batch-element or
    # block boundary (wrap positions coincide with masked f/t borders).
    f_idx = jnp.arange(F).reshape(F, 1)
    t_idx = jnp.arange(T).reshape(1, T)
    masks = []
    for kh in range(K):
        for kw in range(K):
            df, dt = kh - p, kw - p
            m = ((f_idx + df >= 0) & (f_idx + df < F) &
                 (t_idx + dt >= 0) & (t_idx + dt < T))
            masks.append(m.reshape(1, FT))
    taps_mask = jnp.concatenate(masks, axis=0).astype(f32)      # (K*K, F*T)

    # Batch elements packed into the lane axis per grid step. Keep >= 2 grid
    # steps when B >= 2 so v7x's second TensorCore has work.
    if B >= 2:
        cand = [d for d in range(1, min(block_b, B // 2) + 1) if B % d == 0]
        bb = max(cand) if cand else 1
    else:
        bb = 1
    taps_mask_b = jnp.tile(taps_mask, (1, bb))                  # (K*K, bb*F*T)

    # Channels-major, batch-packed, lane-dense layout: (C_pad, B*F*T).
    xpad = jnp.zeros((B, CP, F, T), x.dtype).at[:, :C].set(x)
    x2 = jnp.transpose(xpad, (1, 0, 2, 3)).reshape(CP, B * FT)

    kernel = functools.partial(_residual_cnn_batch_kernel,
                               cp=CP, f=F, t=T, k=K, bb=bb)
    bcast = lambda i: (0, 0)

    out = pl.pallas_call(
        kernel,
        out_shape=jax.ShapeDtypeStruct((CP, B * FT), x.dtype),
        grid=(B // bb,),
        in_specs=[
            pl.BlockSpec((CP, bb * FT), lambda i: (0, i)),      # x slab
            pl.BlockSpec((K * K, bb * FT), bcast),              # boundary masks
            pl.BlockSpec((CP, 3), bcast),                       # [s1, t1, t2]
            pl.BlockSpec((CP, K * K * CP), bcast),              # w1 (matmul form)
            pl.BlockSpec((CP, K * K * CP), bcast),              # w2 (matmul form)
        ],
        out_specs=pl.BlockSpec((CP, bb * FT), lambda i: (0, i)),
        scratch_shapes=[pltpu.VMEM((K * K * CP, bb * FT), jnp.bfloat16)],
        compiler_params=pltpu.CompilerParams(
            dimension_semantics=("parallel",)),   # batch steps are independent
    )(x2, taps_mask_b, bn, w1m, w2m)

    # Back to (B, C, n_feats, time); drop the zero-padded channels.
    return out.reshape(CP, B, F, T).transpose(1, 0, 2, 3)[:, :C]


def _reference(x, g1, b1, m1, v1, g2, b2, m2, v2, w1, w2):
    """Pure-JAX reference of the PyTorch forward (eval mode)."""
    p = w1.shape[-1] // 2

    def bn(h, g, b, m, v):
        g, b, m, v = (a.reshape(1, -1, 1, 1) for a in (g, b, m, v))
        return (h - m) / jnp.sqrt(v + _BN_EPS) * g + b

    def conv(h, w):
        return jax.lax.conv_general_dilated(
            h, w, (1, 1), [(p, p), (p, p)],
            dimension_numbers=("NCHW", "OIHW", "NCHW"),
            precision=jax.lax.Precision.HIGHEST)

    h = conv(jax.nn.relu(bn(x, g1, b1, m1, v1)), w1)
    h = conv(jax.nn.relu(bn(h, g2, b2, m2, v2)), w2)
    return h + x


if __name__ == "__main__":
    # ResidualCNNbatch(in_channels=4, out_channels=4, kernel=3, stride=1,
    #                  dropout=0.1, n_feats=16); input (B, C, n_feats, time).
    B, C, F, T, K = 2, 4, 16, 16, 3

    key = jax.random.PRNGKey(0)
    ks = jax.random.split(key, 11)
    x = jax.random.normal(ks[0], (B, C, F, T), jnp.float32)
    gamma1 = 1.0 + 0.1 * jax.random.normal(ks[1], (C,), jnp.float32)
    beta1 = 0.1 * jax.random.normal(ks[2], (C,), jnp.float32)
    mean1 = 0.1 * jax.random.normal(ks[3], (C,), jnp.float32)
    var1 = 0.5 + jax.random.uniform(ks[4], (C,), jnp.float32)
    gamma2 = 1.0 + 0.1 * jax.random.normal(ks[5], (C,), jnp.float32)
    beta2 = 0.1 * jax.random.normal(ks[6], (C,), jnp.float32)
    mean2 = 0.1 * jax.random.normal(ks[7], (C,), jnp.float32)
    var2 = 0.5 + jax.random.uniform(ks[8], (C,), jnp.float32)
    w1 = 0.2 * jax.random.normal(ks[9], (C, C, K, K), jnp.float32)
    w2 = 0.2 * jax.random.normal(ks[10], (C, C, K, K), jnp.float32)

    out = jax.block_until_ready(residual_cnn_batch_forward(
        x, gamma1, beta1, mean1, var1, gamma2, beta2, mean2, var2, w1, w2))

    ref = jax.block_until_ready(_reference(
        x, gamma1, beta1, mean1, var1, gamma2, beta2, mean2, var2, w1, w2))

    assert out.shape == (B, C, F, T)
    max_err = float(jnp.max(jnp.abs(out - ref)))
    # Tolerance accommodates bf16 MXU inputs (f32 accumulation) through two
    # stacked convs; structural errors (wrong tap/mask/weight/fold ordering)
    # would be O(0.1-1).
    assert max_err < 5e-2, f"mismatch vs reference: {max_err}"
    print("KERNEL_OK")
</pallas_src>

<mosaic_0001>
module attributes {stable_mosaic.version = 11 : i64} {
  func.func @_residual_cnn_batch_kernel(%arg0: i32, %arg1: memref<16x256xf32, #tpu.memory_space<vmem>>, %arg2: memref<9x256xf32, #tpu.memory_space<vmem>>, %arg3: memref<16x3xf32, #tpu.memory_space<vmem>>, %arg4: memref<16x144xbf16, #tpu.memory_space<vmem>>, %arg5: memref<16x144xbf16, #tpu.memory_space<vmem>>, %arg6: memref<16x256xf32, #tpu.memory_space<vmem>>, %arg7: memref<144x256xbf16, #tpu.memory_space<vmem>>) attributes {dimension_semantics = [#tpu.dimension_semantics<parallel>], iteration_bounds = array<i64: 2>, scalar_prefetch = 0 : i64, scratch_operands = 1 : i64, tpu.core_type = #tpu.core_type<tc>, window_params = [{transform_indices = @transform_0, window_bounds = array<i64: 16, 256>}, {pipeline_mode = #tpu.pipeline_mode<synchronous>, transform_indices = @transform_1, window_bounds = array<i64: 9, 256>}, {pipeline_mode = #tpu.pipeline_mode<synchronous>, transform_indices = @transform_2, window_bounds = array<i64: 16, 3>}, {pipeline_mode = #tpu.pipeline_mode<synchronous>, transform_indices = @transform_3, window_bounds = array<i64: 16, 144>}, {pipeline_mode = #tpu.pipeline_mode<synchronous>, transform_indices = @transform_4, window_bounds = array<i64: 16, 144>}, {transform_indices = @transform_5, window_bounds = array<i64: 16, 256>}]} {
    %c0 = arith.constant 0 : index
    %c0_0 = arith.constant 0 : index
    %0 = vector.load %arg1[%c0, %c0_0] : memref<16x256xf32, #tpu.memory_space<vmem>>, vector<16x256xf32>
    %c0_1 = arith.constant 0 : index
    %c0_2 = arith.constant 0 : index
    %1 = vector.load %arg2[%c0_1, %c0_2] : memref<9x256xf32, #tpu.memory_space<vmem>>, vector<9x256xf32>
    %c0_3 = arith.constant 0 : index
    %c0_4 = arith.constant 0 : index
    %2 = vector.load %arg3[%c0_3, %c0_4] : memref<16x3xf32, #tpu.memory_space<vmem>>, vector<16x1xf32>
    %c0_5 = arith.constant 0 : index
    %c1 = arith.constant 1 : index
    %3 = vector.load %arg3[%c0_5, %c1] : memref<16x3xf32, #tpu.memory_space<vmem>>, vector<16x1xf32>
    %c0_6 = arith.constant 0 : index
    %c2 = arith.constant 2 : index
    %4 = vector.load %arg3[%c0_6, %c2] : memref<16x3xf32, #tpu.memory_space<vmem>>, vector<16x1xf32>
    %c0_7 = arith.constant 0 : index
    %c0_8 = arith.constant 0 : index
    %5 = vector.load %arg4[%c0_7, %c0_8] : memref<16x144xbf16, #tpu.memory_space<vmem>>, vector<16x144xbf16>
    %c0_9 = arith.constant 0 : index
    %c0_10 = arith.constant 0 : index
    %6 = vector.load %arg5[%c0_9, %c0_10] : memref<16x144xbf16, #tpu.memory_space<vmem>>, vector<16x144xbf16>
    %7 = vector.broadcast %2 : vector<16x1xf32> to vector<16x256xf32>
    %8 = arith.mulf %0, %7 : vector<16x256xf32>
    %9 = vector.broadcast %3 : vector<16x1xf32> to vector<16x256xf32>
    %10 = arith.addf %8, %9 : vector<16x256xf32>
    %cst = arith.constant 0.000000e+00 : f32
    %11 = vector.broadcast %cst : f32 to vector<16x256xf32>
    %12 = arith.maximumf %10, %11 : vector<16x256xf32>
    %c17_i32 = arith.constant 17 : i32
    %13 = tpu.dynamic_rotate %12 by %c17_i32 dim 1 : vector<16x256xf32>, i32 -> vector<16x256xf32>
    %14 = vector.extract_strided_slice %1 {offsets = [0, 0], sizes = [1, 256], strides = [1, 1]} : vector<9x256xf32> to vector<1x256xf32>
    %15 = vector.broadcast %14 : vector<1x256xf32> to vector<16x256xf32>
    %16 = arith.mulf %13, %15 : vector<16x256xf32>
    %17 = arith.truncf %16 : vector<16x256xf32> to vector<16x256xbf16>
    %c0_11 = arith.constant 0 : index
    %c0_12 = arith.constant 0 : index
    %18 = vector.load %arg7[%c0_11, %c0_12] : memref<144x256xbf16, #tpu.memory_space<vmem>>, vector<16x256xbf16>
    tpu.vector_store %arg7[%c0_11, %c0_12], %17 {strides = array<i32>} : memref<144x256xbf16, #tpu.memory_space<vmem>>, vector<16x256xbf16>,
    %c16_i32 = arith.constant 16 : i32
    %19 = tpu.dynamic_rotate %12 by %c16_i32 dim 1 : vector<16x256xf32>, i32 -> vector<16x256xf32>
    %20 = vector.extract_strided_slice %1 {offsets = [1, 0], sizes = [1, 256], strides = [1, 1]} : vector<9x256xf32> to vector<1x256xf32>
    %21 = vector.broadcast %20 : vector<1x256xf32> to vector<16x256xf32>
    %22 = arith.mulf %19, %21 : vector<16x256xf32>
    %23 = arith.truncf %22 : vector<16x256xf32> to vector<16x256xbf16>
    %c16 = arith.constant 16 : index
    %c0_13 = arith.constant 0 : index
    %24 = vector.load %arg7[%c16, %c0_13] : memref<144x256xbf16, #tpu.memory_space<vmem>>, vector<16x256xbf16>
    tpu.vector_store %arg7[%c16, %c0_13], %23 {strides = array<i32>} : memref<144x256xbf16, #tpu.memory_space<vmem>>, vector<16x256xbf16>,
    %c15_i32 = arith.constant 15 : i32
    %25 = tpu.dynamic_rotate %12 by %c15_i32 dim 1 : vector<16x256xf32>, i32 -> vector<16x256xf32>
    %26 = vector.extract_strided_slice %1 {offsets = [2, 0], sizes = [1, 256], strides = [1, 1]} : vector<9x256xf32> to vector<1x256xf32>
    %27 = vector.broadcast %26 : vector<1x256xf32> to vector<16x256xf32>
    %28 = arith.mulf %25, %27 : vector<16x256xf32>
    %29 = arith.truncf %28 : vector<16x256xf32> to vector<16x256xbf16>
    %c32 = arith.constant 32 : index
    %c0_14 = arith.constant 0 : index
    %30 = vector.load %arg7[%c32, %c0_14] : memref<144x256xbf16, #tpu.memory_space<vmem>>, vector<16x256xbf16>
    tpu.vector_store %arg7[%c32, %c0_14], %29 {strides = array<i32>} : memref<144x256xbf16, #tpu.memory_space<vmem>>, vector<16x256xbf16>,
    %c1_i32 = arith.constant 1 : i32
    %31 = tpu.dynamic_rotate %12 by %c1_i32 dim 1 : vector<16x256xf32>, i32 -> vector<16x256xf32>
    %32 = vector.extract_strided_slice %1 {offsets = [3, 0], sizes = [1, 256], strides = [1, 1]} : vector<9x256xf32> to vector<1x256xf32>
    %33 = vector.broadcast %32 : vector<1x256xf32> to vector<16x256xf32>
    %34 = arith.mulf %31, %33 : vector<16x256xf32>
    %35 = arith.truncf %34 : vector<16x256xf32> to vector<16x256xbf16>
    %c48 = arith.constant 48 : index
    %c0_15 = arith.constant 0 : index
    %36 = vector.load %arg7[%c48, %c0_15] : memref<144x256xbf16, #tpu.memory_space<vmem>>, vector<16x256xbf16>
    tpu.vector_store %arg7[%c48, %c0_15], %35 {strides = array<i32>} : memref<144x256xbf16, #tpu.memory_space<vmem>>, vector<16x256xbf16>,
    %37 = arith.truncf %12 : vector<16x256xf32> to vector<16x256xbf16>
    %c64 = arith.constant 64 : index
    %c0_16 = arith.constant 0 : index
    %38 = vector.load %arg7[%c64, %c0_16] : memref<144x256xbf16, #tpu.memory_space<vmem>>, vector<16x256xbf16>
    tpu.vector_store %arg7[%c64, %c0_16], %37 {strides = array<i32>} : memref<144x256xbf16, #tpu.memory_space<vmem>>, vector<16x256xbf16>,
    %c255_i32 = arith.constant 255 : i32
    %39 = tpu.dynamic_rotate %12 by %c255_i32 dim 1 : vector<16x256xf32>, i32 -> vector<16x256xf32>
    %40 = vector.extract_strided_slice %1 {offsets = [5, 0], sizes = [1, 256], strides = [1, 1]} : vector<9x256xf32> to vector<1x256xf32>
    %41 = vector.broadcast %40 : vector<1x256xf32> to vector<16x256xf32>
    %42 = arith.mulf %39, %41 : vector<16x256xf32>
    %43 = arith.truncf %42 : vector<16x256xf32> to vector<16x256xbf16>
    %c80 = arith.constant 80 : index
    %c0_17 = arith.constant 0 : index
    %44 = vector.load %arg7[%c80, %c0_17] : memref<144x256xbf16, #tpu.memory_space<vmem>>, vector<16x256xbf16>
    tpu.vector_store %arg7[%c80, %c0_17], %43 {strides = array<i32>} : memref<144x256xbf16, #tpu.memory_space<vmem>>, vector<16x256xbf16>,
    %c241_i32 = arith.constant 241 : i32
    %45 = tpu.dynamic_rotate %12 by %c241_i32 dim 1 : vector<16x256xf32>, i32 -> vector<16x256xf32>
    %46 = vector.extract_strided_slice %1 {offsets = [6, 0], sizes = [1, 256], strides = [1, 1]} : vector<9x256xf32> to vector<1x256xf32>
    %47 = vector.broadcast %46 : vector<1x256xf32> to vector<16x256xf32>
    %48 = arith.mulf %45, %47 : vector<16x256xf32>
    %49 = arith.truncf %48 : vector<16x256xf32> to vector<16x256xbf16>
    %c96 = arith.constant 96 : index
    %c0_18 = arith.constant 0 : index
    %50 = vector.load %arg7[%c96, %c0_18] : memref<144x256xbf16, #tpu.memory_space<vmem>>, vector<16x256xbf16>
    tpu.vector_store %arg7[%c96, %c0_18], %49 {strides = array<i32>} : memref<144x256xbf16, #tpu.memory_space<vmem>>, vector<16x256xbf16>,
    %c240_i32 = arith.constant 240 : i32
    %51 = tpu.dynamic_rotate %12 by %c240_i32 dim 1 : vector<16x256xf32>, i32 -> vector<16x256xf32>
    %52 = vector.extract_strided_slice %1 {offsets = [7, 0], sizes = [1, 256], strides = [1, 1]} : vector<9x256xf32> to vector<1x256xf32>
    %53 = vector.broadcast %52 : vector<1x256xf32> to vector<16x256xf32>
    %54 = arith.mulf %51, %53 : vector<16x256xf32>
    %55 = arith.truncf %54 : vector<16x256xf32> to vector<16x256xbf16>
    %c112 = arith.constant 112 : index
    %c0_19 = arith.constant 0 : index
    %56 = vector.load %arg7[%c112, %c0_19] : memref<144x256xbf16, #tpu.memory_space<vmem>>, vector<16x256xbf16>
    tpu.vector_store %arg7[%c112, %c0_19], %55 {strides = array<i32>} : memref<144x256xbf16, #tpu.memory_space<vmem>>, vector<16x256xbf16>,
    %c239_i32 = arith.constant 239 : i32
    %57 = tpu.dynamic_rotate %12 by %c239_i32 dim 1 : vector<16x256xf32>, i32 -> vector<16x256xf32>
    %58 = vector.extract_strided_slice %1 {offsets = [8, 0], sizes = [1, 256], strides = [1, 1]} : vector<9x256xf32> to vector<1x256xf32>
    %59 = vector.broadcast %58 : vector<1x256xf32> to vector<16x256xf32>
    %60 = arith.mulf %57, %59 : vector<16x256xf32>
    %61 = arith.truncf %60 : vector<16x256xf32> to vector<16x256xbf16>
    %c128 = arith.constant 128 : index
    %c0_20 = arith.constant 0 : index
    %62 = vector.load %arg7[%c128, %c0_20] : memref<144x256xbf16, #tpu.memory_space<vmem>>, vector<16x256xbf16>
    tpu.vector_store %arg7[%c128, %c0_20], %61 {strides = array<i32>} : memref<144x256xbf16, #tpu.memory_space<vmem>>, vector<16x256xbf16>,
    %c0_21 = arith.constant 0 : index
    %c0_22 = arith.constant 0 : index
    %63 = vector.load %arg7[%c0_21, %c0_22] : memref<144x256xbf16, #tpu.memory_space<vmem>>, vector<144x256xbf16>
    %cst_23 = arith.constant dense<0.000000e+00> : vector<16x256xf32>
    %64 = tpu.matmul %5, %63, %cst_23 {dimension_numbers = #tpu.dot_dimension_numbers<[1], [0], [0], [1], [0, 0, 1, 1], [], []>} : vector<16x144xbf16>, vector<144x256xbf16>, vector<16x256xf32> -> vector<16x256xf32>
    %65 = vector.broadcast %4 : vector<16x1xf32> to vector<16x256xf32>
    %66 = arith.addf %64, %65 : vector<16x256xf32>
    %cst_24 = arith.constant 0.000000e+00 : f32
    %67 = vector.broadcast %cst_24 : f32 to vector<16x256xf32>
    %68 = arith.maximumf %66, %67 : vector<16x256xf32>
    %c17_i32_25 = arith.constant 17 : i32
    %69 = tpu.dynamic_rotate %68 by %c17_i32_25 dim 1 : vector<16x256xf32>, i32 -> vector<16x256xf32>
    %70 = vector.extract_strided_slice %1 {offsets = [0, 0], sizes = [1, 256], strides = [1, 1]} : vector<9x256xf32> to vector<1x256xf32>
    %71 = vector.broadcast %70 : vector<1x256xf32> to vector<16x256xf32>
    %72 = arith.mulf %69, %71 : vector<16x256xf32>
    %73 = arith.truncf %72 : vector<16x256xf32> to vector<16x256xbf16>
    %c0_26 = arith.constant 0 : index
    %c0_27 = arith.constant 0 : index
    %74 = vector.load %arg7[%c0_26, %c0_27] : memref<144x256xbf16, #tpu.memory_space<vmem>>, vector<16x256xbf16>
    tpu.vector_store %arg7[%c0_26, %c0_27], %73 {strides = array<i32>} : memref<144x256xbf16, #tpu.memory_space<vmem>>, vector<16x256xbf16>,
    %c16_i32_28 = arith.constant 16 : i32
    %75 = tpu.dynamic_rotate %68 by %c16_i32_28 dim 1 : vector<16x256xf32>, i32 -> vector<16x256xf32>
    %76 = vector.extract_strided_slice %1 {offsets = [1, 0], sizes = [1, 256], strides = [1, 1]} : vector<9x256xf32> to vector<1x256xf32>
    %77 = vector.broadcast %76 : vector<1x256xf32> to vector<16x256xf32>
    %78 = arith.mulf %75, %77 : vector<16x256xf32>
    %79 = arith.truncf %78 : vector<16x256xf32> to vector<16x256xbf16>
    %c16_29 = arith.constant 16 : index
    %c0_30 = arith.constant 0 : index
    %80 = vector.load %arg7[%c16_29, %c0_30] : memref<144x256xbf16, #tpu.memory_space<vmem>>, vector<16x256xbf16>
    tpu.vector_store %arg7[%c16_29, %c0_30], %79 {strides = array<i32>} : memref<144x256xbf16, #tpu.memory_space<vmem>>, vector<16x256xbf16>,
    %c15_i32_31 = arith.constant 15 : i32
    %81 = tpu.dynamic_rotate %68 by %c15_i32_31 dim 1 : vector<16x256xf32>, i32 -> vector<16x256xf32>
    %82 = vector.extract_strided_slice %1 {offsets = [2, 0], sizes = [1, 256], strides = [1, 1]} : vector<9x256xf32> to vector<1x256xf32>
    %83 = vector.broadcast %82 : vector<1x256xf32> to vector<16x256xf32>
    %84 = arith.mulf %81, %83 : vector<16x256xf32>
    %85 = arith.truncf %84 : vector<16x256xf32> to vector<16x256xbf16>
    %c32_32 = arith.constant 32 : index
    %c0_33 = arith.constant 0 : index
    %86 = vector.load %arg7[%c32_32, %c0_33] : memref<144x256xbf16, #tpu.memory_space<vmem>>, vector<16x256xbf16>
    tpu.vector_store %arg7[%c32_32, %c0_33], %85 {strides = array<i32>} : memref<144x256xbf16, #tpu.memory_space<vmem>>, vector<16x256xbf16>,
    %c1_i32_34 = arith.constant 1 : i32
    %87 = tpu.dynamic_rotate %68 by %c1_i32_34 dim 1 : vector<16x256xf32>, i32 -> vector<16x256xf32>
    %88 = vector.extract_strided_slice %1 {offsets = [3, 0], sizes = [1, 256], strides = [1, 1]} : vector<9x256xf32> to vector<1x256xf32>
    %89 = vector.broadcast %88 : vector<1x256xf32> to vector<16x256xf32>
    %90 = arith.mulf %87, %89 : vector<16x256xf32>
    %91 = arith.truncf %90 : vector<16x256xf32> to vector<16x256xbf16>
    %c48_35 = arith.constant 48 : index
    %c0_36 = arith.constant 0 : index
    %92 = vector.load %arg7[%c48_35, %c0_36] : memref<144x256xbf16, #tpu.memory_space<vmem>>, vector<16x256xbf16>
    tpu.vector_store %arg7[%c48_35, %c0_36], %91 {strides = array<i32>} : memref<144x256xbf16, #tpu.memory_space<vmem>>, vector<16x256xbf16>,
    %93 = arith.truncf %68 : vector<16x256xf32> to vector<16x256xbf16>
    %c64_37 = arith.constant 64 : index
    %c0_38 = arith.constant 0 : index
    %94 = vector.load %arg7[%c64_37, %c0_38] : memref<144x256xbf16, #tpu.memory_space<vmem>>, vector<16x256xbf16>
    tpu.vector_store %arg7[%c64_37, %c0_38], %93 {strides = array<i32>} : memref<144x256xbf16, #tpu.memory_space<vmem>>, vector<16x256xbf16>,
    %c255_i32_39 = arith.constant 255 : i32
    %95 = tpu.dynamic_rotate %68 by %c255_i32_39 dim 1 : vector<16x256xf32>, i32 -> vector<16x256xf32>
    %96 = vector.extract_strided_slice %1 {offsets = [5, 0], sizes = [1, 256], strides = [1, 1]} : vector<9x256xf32> to vector<1x256xf32>
    %97 = vector.broadcast %96 : vector<1x256xf32> to vector<16x256xf32>
    %98 = arith.mulf %95, %97 : vector<16x256xf32>
    %99 = arith.truncf %98 : vector<16x256xf32> to vector<16x256xbf16>
    %c80_40 = arith.constant 80 : index
    %c0_41 = arith.constant 0 : index
    %100 = vector.load %arg7[%c80_40, %c0_41] : memref<144x256xbf16, #tpu.memory_space<vmem>>, vector<16x256xbf16>
    tpu.vector_store %arg7[%c80_40, %c0_41], %99 {strides = array<i32>} : memref<144x256xbf16, #tpu.memory_space<vmem>>, vector<16x256xbf16>,
    %c241_i32_42 = arith.constant 241 : i32
    %101 = tpu.dynamic_rotate %68 by %c241_i32_42 dim 1 : vector<16x256xf32>, i32 -> vector<16x256xf32>
    %102 = vector.extract_strided_slice %1 {offsets = [6, 0], sizes = [1, 256], strides = [1, 1]} : vector<9x256xf32> to vector<1x256xf32>
    %103 = vector.broadcast %102 : vector<1x256xf32> to vector<16x256xf32>
    %104 = arith.mulf %101, %103 : vector<16x256xf32>
    %105 = arith.truncf %104 : vector<16x256xf32> to vector<16x256xbf16>
    %c96_43 = arith.constant 96 : index
    %c0_44 = arith.constant 0 : index
    %106 = vector.load %arg7[%c96_43, %c0_44] : memref<144x256xbf16, #tpu.memory_space<vmem>>, vector<16x256xbf16>
    tpu.vector_store %arg7[%c96_43, %c0_44], %105 {strides = array<i32>} : memref<144x256xbf16, #tpu.memory_space<vmem>>, vector<16x256xbf16>,
    %c240_i32_45 = arith.constant 240 : i32
    %107 = tpu.dynamic_rotate %68 by %c240_i32_45 dim 1 : vector<16x256xf32>, i32 -> vector<16x256xf32>
    %108 = vector.extract_strided_slice %1 {offsets = [7, 0], sizes = [1, 256], strides = [1, 1]} : vector<9x256xf32> to vector<1x256xf32>
    %109 = vector.broadcast %108 : vector<1x256xf32> to vector<16x256xf32>
    %110 = arith.mulf %107, %109 : vector<16x256xf32>
    %111 = arith.truncf %110 : vector<16x256xf32> to vector<16x256xbf16>
    %c112_46 = arith.constant 112 : index
    %c0_47 = arith.constant 0 : index
    %112 = vector.load %arg7[%c112_46, %c0_47] : memref<144x256xbf16, #tpu.memory_space<vmem>>, vector<16x256xbf16>
    tpu.vector_store %arg7[%c112_46, %c0_47], %111 {strides = array<i32>} : memref<144x256xbf16, #tpu.memory_space<vmem>>, vector<16x256xbf16>,
    %c239_i32_48 = arith.constant 239 : i32
    %113 = tpu.dynamic_rotate %68 by %c239_i32_48 dim 1 : vector<16x256xf32>, i32 -> vector<16x256xf32>
    %114 = vector.extract_strided_slice %1 {offsets = [8, 0], sizes = [1, 256], strides = [1, 1]} : vector<9x256xf32> to vector<1x256xf32>
    %115 = vector.broadcast %114 : vector<1x256xf32> to vector<16x256xf32>
    %116 = arith.mulf %113, %115 : vector<16x256xf32>
    %117 = arith.truncf %116 : vector<16x256xf32> to vector<16x256xbf16>
    %c128_49 = arith.constant 128 : index
    %c0_50 = arith.constant 0 : index
    %118 = vector.load %arg7[%c128_49, %c0_50] : memref<144x256xbf16, #tpu.memory_space<vmem>>, vector<16x256xbf16>
    tpu.vector_store %arg7[%c128_49, %c0_50], %117 {strides = array<i32>} : memref<144x256xbf16, #tpu.memory_space<vmem>>, vector<16x256xbf16>,
    %c0_51 = arith.constant 0 : index
    %c0_52 = arith.constant 0 : index
    %119 = vector.load %arg7[%c0_51, %c0_52] : memref<144x256xbf16, #tpu.memory_space<vmem>>, vector<144x256xbf16>
    %cst_53 = arith.constant dense<0.000000e+00> : vector<16x256xf32>
    %120 = tpu.matmul %6, %119, %cst_53 {dimension_numbers = #tpu.dot_dimension_numbers<[1], [0], [0], [1], [0, 0, 1, 1], [], []>} : vector<16x144xbf16>, vector<144x256xbf16>, vector<16x256xf32> -> vector<16x256xf32>
    %121 = arith.addf %120, %0 : vector<16x256xf32>
    %c0_54 = arith.constant 0 : index
    %c0_55 = arith.constant 0 : index
    %122 = vector.load %arg6[%c0_54, %c0_55] : memref<16x256xf32, #tpu.memory_space<vmem>>, vector<16x256xf32>
    tpu.vector_store %arg6[%c0_54, %c0_55], %121 {strides = array<i32>} : memref<16x256xf32, #tpu.memory_space<vmem>>, vector<16x256xf32>,
    return
  }
  func.func @transform_0(%arg0: i32) -> (i32, i32) {
    %c0_i32 = arith.constant 0 : i32
    %c0_i32_0 = arith.constant 0 : i32
    return %c0_i32, %arg0 : i32, i32
  }
  func.func @transform_1(%arg0: i32) -> (i32, i32) {
    %c0_i32 = arith.constant 0 : i32
    %c0_i32_0 = arith.constant 0 : i32
    %c0_i32_1 = arith.constant 0 : i32
    return %c0_i32, %c0_i32_0 : i32, i32
  }
  func.func @transform_2(%arg0: i32) -> (i32, i32) {
    %c0_i32 = arith.constant 0 : i32
    %c0_i32_0 = arith.constant 0 : i32
    %c0_i32_1 = arith.constant 0 : i32
    return %c0_i32, %c0_i32_0 : i32, i32
  }
  func.func @transform_3(%arg0: i32) -> (i32, i32) {
    %c0_i32 = arith.constant 0 : i32
    %c0_i32_0 = arith.constant 0 : i32
    %c0_i32_1 = arith.constant 0 : i32
    return %c0_i32, %c0_i32_0 : i32, i32
  }
  func.func @transform_4(%arg0: i32) -> (i32, i32) {
    %c0_i32 = arith.constant 0 : i32
    %c0_i32_0 = arith.constant 0 : i32
    %c0_i32_1 = arith.constant 0 : i32
    return %c0_i32, %c0_i32_0 : i32, i32
  }
  func.func @transform_5(%arg0: i32) -> (i32, i32) {
    %c0_i32 = arith.constant 0 : i32
    %c0_i32_0 = arith.constant 0 : i32
    return %c0_i32, %arg0 : i32, i32
  }
}

</mosaic_0001>

<bundles_post_ra>
// kernel: tpu_custom_call.1
= control target key start
LH: loop header
LB: loop body
LE: loop exit
PB: predicated region body
PF: predicated region fallthrough
CT: control target
= control target key end

     0   :  { %10 = vsyncpa [#allocation4], 0  ;;  %s1960_s0 = inlined_call_operand.hbm [shape: f32[16,512], index: 0, kind: input, shape index: {}]   ;;  %s1961_s1 = inlined_call_operand.hbm [shape: f32[9,256], index: 1, kind: input, shape index: {}]   ;;  %s1962_s2 = inlined_call_operand.vmem [shape: f32[16,3], index: 2, kind: input, shape index: {}]   ;;  %s1963_s3 = inlined_call_operand.vmem [shape: bf16[16,144], index: 3, kind: input, shape index: {}]   ;;  %s1964_s4 = inlined_call_operand.vmem [shape: bf16[16,144], index: 4, kind: input, shape index: {}]   ;;  %s1965_s5 = inlined_call_operand.hbm [shape: f32[16,512], index: 5, kind: output, shape index: {}]  }
   0x1   :  { %12 = vsyncpa [#allocation4 + $0x1], 0 }
   0x2   :  { %13 = vsyncpa [#allocation7], 0 }
   0x3   :  { %14 = vsyncpa [#allocation5], 0 }
   0x4   :  { %16 = vsyncpa [#allocation5 + $0x1], 0  ;;  %s1255_s18 = smov 0   ;;  %s1257_s19 = smov 0  }
   0x5   :  { %s1259_s20 = smov 0   ;;  %s1261_s21 = smov 0  }
   0x6 LB: > { %s1276_s22 = sadd.s32 4294967295, %s1204_s21   ;;  %s967_s23 = sadd.s32 4294967294, %s1204_s21   ;;  %s1204_s21 = sphi %s1261_s21, %s1991_s21   ;;  %s1200_s20 = sphi %s1259_s20, %s1990_s20   ;;  %s1196_s19 = sphi %s1257_s19, %s1989_s19   ;;  %s1192_s18 = sphi %s1255_s18, %s1988_s18  }
   0x7   : > { %s1280_s24 = sadd.s32 1, %s1204_s21   ;;  %s29_s25 = sadd.s32 1, %s1200_s20 }
   0x8   : > { %s26_s26 = ssub.s32 %s1204_s21, %s1280_s24  ;;  %p36_p0 = scmp.ne.s32.totalorder %s1200_s20, %s1196_s19 }
   0x9   : > { %p27_p1 = scmp.eq.s32.totalorder %s26_s26, 0  ;;  %p37_p2 = scmp.eq.s32.totalorder %s1204_s21, 0 }
   0xa   : > { %p42_p3 = scmp.ne.s32.totalorder %s1196_s19, %s1192_s18  ;;  %p1966_p4 = scmp.eq.s32.totalorder %s1276_s22, 0 }
   0xb   : > { %s1292_s27 = scalar_select %p27_p1, %s1200_s20, %s29_s25  }
   0xc   : > { %p1294_p5 = por %p37_p2, %p36_p0  ;;  %p1300_p6 = por %p1966_p4, %p42_p3 }
   0xd   : > { %p150_p7 = scmp.eq.s32.totalorder %s1276_s22, 1  ;;  %p156_p8 = scmp.eq.s32.totalorder %s967_s23, 1 }
   0xe   : > { %s1971_s28 = scalar_select %p1294_p5, 1, 0 }
   0xf   : > { %s1972_s29 = scalar_select %p1300_p6, 1, 0 }
  0x10   : > { %p968_p9 = scmp.ge.s32.totalorder %s1204_s21, 1  ;;  %p163_p10 = scmp.lt.s32.totalorder %s1204_s21, 3 }
  0x11   : > { %p1307_p11 = por %p150_p7, %p36_p0  ;;  %p1311_p12 = por %p156_p8, %p42_p3 }
  0x12   : > { %p1315_p13 = pnand %p968_p9, %p163_p10  ;;  %s1206_s8 = smov [#allocation6]  }
  0x13   : > { %s1973_s30 = scalar_select %p1307_p11, 1, 0 }
  0x14   : > { %s1974_s6 = scalar_select %p1311_p12, 1, 0 }
  0x15   : > { %s1975_s7 = scalar_select %p1315_p13, 1, 0 }
  0x16   : > { %p1001_p1 = pneg %p1315_p13  ;;  %s175_s9 = sshll.u32 %s1206_s8, 4  ;;  %s176_s9 = int_to_ptr.vmem [resolvable:$true] %s175_s9 }
  0x17   : > { %s198_s11 = sand.u32 1, %s1200_s20   ;;  %s1076_s14 = scalar_lea.hbm %s1961_s1, 512 }
  0x18   : > { %p1323_p2 = pnand %p1001_p1, %p1966_p4  ;;  %p1077_p7 = scmp.ne.s32.totalorder %s1961_s1, %s1076_s14 }
  0x19   : > { %p1083_p1 = scmp.lt.u32.totalorder %s1076_s14, %s1961_s1 }
  0x1a   : > { %p1078_p8 = pneg %p1323_p2 }
  0x1c   : > { %p1079_p9 = pnand %p1078_p8, %p1077_p7 }
  0x1e   : > { %p1080_p10 = pneg %p1079_p9 }
  0x20   : > { %p1085_p4 = pnand %p1083_p1, %p1080_p10 }
  0x22   : > { %1088 = shalt.err (!%p1085_p4)
}
  0x23   : > { %s1089_s25 = scalar_lea.vmem %s176_s9, 512  ;;  %p1097_p11 = scmp.lt.s32.totalorder %s176_s9, %s176_s9 }
  0x24   : > { %p1090_p0 = scmp.ne.s32.totalorder %s176_s9, %s1089_s25  ;;  %p1098_p6 = scmp.lt.s32.totalorder %s1089_s25, %s1089_s25 }
  0x26   : > { %p1092_p3 = pnand %p1090_p0, %p1078_p8  ;;  %p1099_p13 = por %p1098_p6, %p1097_p11 }
  0x28   : > { %p1093_p12 = pneg %p1092_p3 }
  0x2a   : > { %p1100_p5 = pnand %p1099_p13, %p1093_p12 }
  0x2c   : > { %1103 = shalt.err (!%p1100_p5)
}
  0x2d   : > { %s1970_s26 = smov 256   ;;  %s1208_s8 = smov 16  }
  0x2e   : > { %1004 = dma.hbm_to_vmem [thread:$0]  (!%p1323_p2), %s1961_s1, 512, %s176_s9, [#allocation7], %s1970_s26, %s1970_s26, %s1208_s8  }
  0x2f   : > { %p1977_p4 = scmp.ne.s32.totalorder %s1971_s28, 0  ;;  %p1978_p0 = scmp.lt.s32.totalorder %s1204_s21, 2 }
  0x30   : > { %s971_s15 = sshll.u32 %s198_s11, 5  ;;  %s991_s16 = sshll.u32 %s1204_s21, 8 }
  0x31   : > { %p1353_p3 = pnand %p1978_p0, %p1977_p4  ;;  %s1361_s10 = scalar_lea.hbm %s1960_s0, %s991_s16 }
  0x32   : > { %s202_s9 = scalar_lea.vmem [#allocation3], %s971_s15  ;;  %s1365_s25 = scalar_lea.sflag [#allocation4], %s198_s11 }
  0x33   : > { %s209_s28 = sshll.u32 %s202_s9, 4  ;;  %s1104_s12 = scalar_lea.hbm %s1361_s10, 512  ;;  %s1363_s28 = int_to_ptr.vmem [resolvable:$true] %s209_s28 }
  0x34   : > { %p1105_p5 = scmp.ne.s32.totalorder %s1361_s10, %s1104_s12  ;;  %p1106_p6 = pneg %p1353_p3 }
  0x35   : > { %s1109_s17 = scalar_lea.hbm %s1960_s0, 1024  ;;  %p1110_p13 = scmp.lt.u32.totalorder %s1361_s10, %s1960_s0 }
  0x36   : > { %p1107_p11 = pnand %p1106_p6, %p1105_p5  ;;  %p1111_p2 = scmp.lt.u32.totalorder %s1109_s17, %s1104_s12 }
  0x37   : > { %p1113_p8 = scmp.lt.u32.totalorder %s1104_s12, %s1361_s10 }
  0x38   : > { %p1108_p12 = pneg %p1107_p11  ;;  %p1112_p7 = por %p1111_p2, %p1110_p13 }
  0x3a   : > { %p1114_p9 = por %p1113_p8, %p1112_p7 }
  0x3c   : > { %p1115_p10 = pnand %p1114_p9, %p1108_p12 }
  0x3e   : > { %1118 = shalt.err (!%p1115_p10)
}
  0x3f   : > { %s1119_s11 = scalar_lea.vmem %s1363_s28, 512  ;;  %s1209_s15 = smov [#allocation3]  }
  0x40   : > { %p1120_p1 = scmp.ne.s32.totalorder %s1363_s28, %s1119_s11  ;;  %s1124_s9 = sshll.u32 %s1209_s15, 4  ;;  %s1125_s9 = int_to_ptr.vmem [resolvable:$false] %s1124_s9 }
  0x41   : > { %s1126_s26 = scalar_lea.vmem %s1125_s9, 1024  ;;  %p1127_p5 = scmp.lt.s32.totalorder %s1363_s28, %s1125_s9 }
  0x42   : > { %p1122_p4 = pnand %p1120_p1, %p1106_p6  ;;  %p1128_p11 = scmp.lt.s32.totalorder %s1126_s26, %s1119_s11 }
  0x44   : > { %p1123_p0 = pneg %p1122_p4  ;;  %p1129_p13 = por %p1128_p11, %p1127_p5 }
  0x46   : > { %p1130_p2 = pnand %p1129_p13, %p1123_p0 }
  0x48   : > { %1133 = shalt.err (!%p1130_p2)
}
  0x49   : > { %s1210_s12 = smov 512   ;;  %s1980_s13 = smov 256  }
  0x4a   : > { %1008 = dma.hbm_to_vmem [thread:$0]  (!%p1353_p3), %s1361_s10, 512, %s1363_s28, %s1365_s25, %s1210_s12, %s1980_s13, %s1208_s8  }
  0x4b   : > { %p1981_p6 = scmp.ne.s32.totalorder %s1975_s7, 0 }
  0x4c   : > { %s1398_s16 = sand.u32 (!%p1981_p6), 1, %s1196_s19   ;;  %p1982_p12 = scmp.ne.s32.totalorder (!%p1981_p6), %s1972_s29, 0 }
  0x4d   : > { %221 = sbr.rel (%p1981_p6) target bundleno = 1046 (0x416), region = 40  ;;  %s975_s17 = sshll.u32 (!%p1981_p6), %s1398_s16, 5 }
  0x4e   : > { %s224_s23 = scalar_lea.sflag (!%p1981_p6), [#allocation4], %s1398_s16  ;;  %s227_s14 = scalar_lea.vmem (!%p1981_p6), [#allocation3], %s975_s17 }
  0x54   : > { %1179 = dma.done.wait (%p1982_p12), %s224_s23, 512  }
  0x55   : > { %1181 = vsyncadd (%p1982_p12), %s224_s23, 4294966784  ;;  %p1983_p3 = scmp.eq.s32.totalorder %s1276_s22, 0 }
  0x57   : > { %1183 = dma.done.wait (%p1983_p3), [#allocation7], 512   ;;  %p1984_p7 = pmov %p1983_p3 }
  0x58   : > { %v1211_v0 = vmov 1   ;;  %v1212_v1 = vmov 0   ;;  %v1415_v2 = vld [vmem:[%s1962_s2] sm:$0xff]  ;;  %v1422_v3 = vld [vmem:[%s1962_s2 + $0x8] sm:$0xff]  ;;  %v1432_v10 = vld [vmem:[%s227_s14 + $0x10] sm:$0xff]  ;;  %s1213_s28 = smov 17   ;;  %v313_v28 = vlaneseq }
  0x59   : > { %1185 = vsyncadd (%p1984_p7), [#allocation7], 4294966784  ;;  %1067 = vset.pattern.permute.xlu1 %v1211_v0  ;;  %1066 = vset.pattern.permute.xlu0 %v1212_v1  ;;  %v1426_v4 = vld [vmem:[%s227_s14] sm:$0xff]  ;;  %v1428_v5 = vld [vmem:[%s227_s14 + $0x8] sm:$0xff]  ;;  %s1214_s25 = smov 16   ;;  %s1215_s11 = smov 15  }
  0x5a   : > { %290 = vperm.xlu1 %1067, %v1415_v2   ;;  %277 = vperm.xlu0 %1066, %v1415_v2   ;;  %v1434_v11 = vld [vmem:[%s227_s14 + $0x18] sm:$0xff]  ;;  %s1216_s15 = smov 1   ;;  %s1217_s9 = smov 127   ;;  %v1072_v26 = vld [vmem:[%s1963_s3 + $0x4] ss:$8 sps:$4 sm:$0xff]   ;;  %vm578_vm0 = vcmask 130048  }
  0x5b   : > { %s1218_s26 = smov 113   ;;  %s1219_s12 = smov 112   ;;  %982 = vmatprep.mubr.msk.bf16.mxu0 %vm578_vm0, %v1072_v26  ;;  %v1221_v27 = vmov 2   ;;  %v1520_v29 = vshrl.u32 %v313_v28, 7  ;;  %v1522_v31 = vand.u32 127, %v313_v28  ;;  %v1525_v33 = vld [vmem:[#allocation6] sm:$0xff] }
  0x5c   : > { %s1220_s13 = smov 111   ;;  %v1527_v34 = vld [vmem:[#allocation6 + $0x8] sm:$0xff]  ;;  %p1985_p9 = scmp.ne.s32.totalorder %s1973_s30, 0 }
  0x5d   : > { %v322_v32 = vsub.s32 0, %v1520_v29  ;;  %vm315_vm1 = vcmp.lt.s32.totalorder %v1522_v31, 17  ;;  %v351_v45 = vsub.s32 1, %v1520_v29  ;;  %vm344_vm2 = vcmp.lt.s32.totalorder %v1522_v31, 16  ;;  %s1222_s14 = smov [#allocation8]  }
  0x5e   : > { %294 = vperm.xlu1 %1067, %v1422_v3   ;;  %282 = vperm.xlu0 %1066, %v1422_v3   ;;  %v380_v62 = vsub.s32 2, %v1520_v29  ;;  %vm373_vm3 = vcmp.lt.s32.totalorder %v1522_v31, 15  ;;  %vm402_vm4 = vcmp.lt.s32.totalorder %v1522_v31, 1  ;;  %vm435_vm5 = vcmp.lt.s32.totalorder %v1522_v31, 127  ;;  %s1138_s7 = sshll.u32 %s1222_s14, 4  ;;  %s1139_s7 = int_to_ptr.vmem [resolvable:$false] %s1138_s7 }
  0x5f   : > { %v1531_v37 = vrot.slane %v1525_v33, %v322_v32  ;;  %v1534_v38 = vrot.slane %v1527_v34, %v322_v32  ;;  %v1551_v54 = vrot.slane %v1525_v33, %v351_v45  ;;  %v1554_v55 = vrot.slane %v1527_v34, %v351_v45  ;;  %s1140_s8 = scalar_lea.vmem %s1139_s7, 1024 }
  0x60   : > { %vm464_vm6 = vcmp.lt.s32.totalorder %v1522_v31, 113  ;;  %vm493_vm7 = vcmp.lt.s32.totalorder %v1522_v31, 112  ;;  %vm522_vm8 = vcmp.lt.s32.totalorder %v1522_v31, 111 }
  0x62   : > { %1068 = vset.pattern.permute.xlu0 %v1221_v27  ;;  %1069 = vset.pattern.permute.xlu1 %v1221_v27 }
  0xd9   : > { %v291_v6 = vpop.permute.xlu1 %290  ;;  %v278_v7 = vpop.permute.xlu0 %277 }
  0xda   : > { %v285_v8 = vmul.f32 %v278_v7, %v1426_v4  ;;  %v286_v9 = vmul.f32 %v278_v7, %v1428_v5 }
  0xdc   : > { %v297_v12 = vadd.f32 %v291_v6, %v285_v8  ;;  %v298_v14 = vadd.f32 %v291_v6, %v286_v9  ;;  %v1571_v9 = vrot.slane %v1525_v33, %v380_v62 }
  0xdd   : > { %v283_v13 = vpop.permute.xlu0 %282  ;;  %v295_v18 = vpop.permute.xlu1 %294 }
  0xde   : > { %v1436_v15 = vmax.f32 %v297_v12, 0.0  ;;  %v287_v16 = vmul.f32 %v283_v13, %v1432_v10  ;;  %v288_v17 = vmul.f32 %v283_v13, %v1434_v11  ;;  %v1442_v21 = vmax.f32 %v298_v14, 0.0 }
  0xdf   : > { %v1574_v12 = vrot.slane %v1527_v34, %v380_v62 }
  0xe0   : > { %v299_v19 = vadd.f32 %v295_v18, %v287_v16  ;;  %v300_v20 = vadd.f32 %v295_v18, %v288_v17  ;;  %305 = vrot.lane.b32.xlu0 %v1436_v15, %s1213_s28 }
  0xe2   : > { %v1444_v22 = vmax.f32 %v299_v19, 0.0  ;;  %v1446_v23 = vmax.f32 %v300_v20, 0.0  ;;  %v409_v20 = vsub.s32 3, %v1520_v29 }
  0xe4   : > { %307 = vrot.lane.b32.xlu1 %v1444_v22, %s1213_s28  ;;  %309 = vrot.lane.b32.xlu0 %v1442_v21, %s1213_s28  ;;  %v424_v24 = vpack.c.bf16 %v1446_v23, %v1442_v21  ;;  %v423_v25 = vpack.c.bf16 %v1444_v22, %v1436_v15 }
  0xe8   : > { %311 = vrot.lane.b32.xlu1 %v1446_v23, %s1213_s28  ;;  %336 = vrot.lane.b32.xlu0 %v1436_v15, %s1214_s25 }
  0xec   : > { %338 = vrot.lane.b32.xlu1 %v1444_v22, %s1214_s25  ;;  %340 = vrot.lane.b32.xlu0 %v1442_v21, %s1214_s25 }
  0xf0   : > { %342 = vrot.lane.b32.xlu1 %v1446_v23, %s1214_s25  ;;  %365 = vrot.lane.b32.xlu0 %v1436_v15, %s1215_s11 }
  0xf4   : > { %367 = vrot.lane.b32.xlu1 %v1444_v22, %s1215_s11  ;;  %369 = vrot.lane.b32.xlu0 %v1442_v21, %s1215_s11 }
  0xf8   : > { %371 = vrot.lane.b32.xlu1 %v1446_v23, %s1215_s11  ;;  %394 = vrot.lane.b32.xlu0 %v1436_v15, %s1216_s15 }
  0xfc   : > { %396 = vrot.lane.b32.xlu1 %v1444_v22, %s1216_s15  ;;  %398 = vrot.lane.b32.xlu0 %v1442_v21, %s1216_s15 }
 0x100   : > { %400 = vrot.lane.b32.xlu1 %v1446_v23, %s1216_s15  ;;  %427 = vrot.lane.b32.xlu0 %v1436_v15, %s1217_s9 }
 0x104   : > { %429 = vrot.lane.b32.xlu1 %v1444_v22, %s1217_s9  ;;  %431 = vrot.lane.b32.xlu0 %v1442_v21, %s1217_s9 }
 0x108   : > { %433 = vrot.lane.b32.xlu1 %v1446_v23, %s1217_s9  ;;  %456 = vrot.lane.b32.xlu0 %v1436_v15, %s1218_s26 }
 0x10c   : > { %458 = vrot.lane.b32.xlu1 %v1444_v22, %s1218_s26  ;;  %460 = vrot.lane.b32.xlu0 %v1442_v21, %s1218_s26 }
 0x110   : > { %462 = vrot.lane.b32.xlu1 %v1446_v23, %s1218_s26  ;;  %485 = vrot.lane.b32.xlu0 %v1436_v15, %s1219_s12 }
 0x114   : > { %487 = vrot.lane.b32.xlu1 %v1444_v22, %s1219_s12  ;;  %489 = vrot.lane.b32.xlu0 %v1442_v21, %s1219_s12 }
 0x118   : > { %491 = vrot.lane.b32.xlu1 %v1446_v23, %s1219_s12  ;;  %514 = vrot.lane.b32.xlu0 %v1436_v15, %s1220_s13 }
 0x11c   : > { %516 = vrot.lane.b32.xlu1 %v1444_v22, %s1220_s13  ;;  %518 = vrot.lane.b32.xlu0 %v1442_v21, %s1220_s13 }
 0x120   : > { %520 = vrot.lane.b32.xlu1 %v1446_v23, %s1220_s13  ;;  %562 = vperm.xlu0 %1068, %v1415_v2  }
 0x124   : > { %566 = vperm.xlu1 %1069, %v1422_v3  }
 0x152   : > { %v306_v30 = vpop.permute.xlu0 %305 }
 0x156   : > { %v308_v35 = vpop.permute.xlu1 %307  ;;  %v310_v36 = vpop.permute.xlu0 %309 }
 0x157   : > { %v316_v39 = vsel %vm315_vm1, %v306_v30, %v310_v36  ;;  %v318_v40 = vsel %vm315_vm1, %v310_v36, %v306_v30 }
 0x158   : > { %v328_v46 = vmul.f32 %v1531_v37, %v318_v40  ;;  %v329_v48 = vmul.f32 %v1534_v38, %v316_v39  ;;  %v1591_v40 = vrot.slane %v1525_v33, %v409_v20 }
 0x15a   : > { %v312_v41 = vpop.permute.xlu1 %311  ;;  %v337_v42 = vpop.permute.xlu0 %336 }
 0x15b   : > { %v317_v43 = vsel %vm315_vm1, %v308_v35, %v312_v41  ;;  %v319_v44 = vsel %vm315_vm1, %v312_v41, %v308_v35  ;;  %v1594_v41 = vrot.slane %v1527_v34, %v409_v20 }
 0x15c   : > { %v330_v47 = vmul.f32 %v1531_v37, %v319_v44  ;;  %v331_v49 = vmul.f32 %v1534_v38, %v317_v43 }
 0x15e   : > { %v339_v50 = vpop.permute.xlu1 %338  ;;  %v341_v51 = vpop.permute.xlu0 %340  ;;  %v333_v52 = vpack.c.bf16 %v331_v49, %v329_v48  ;;  %v332_v53 = vpack.c.bf16 %v330_v47, %v328_v46  ;;  %v442_v48 = vsub.s32 5, %v1520_v29 }
 0x15f   : > { %v345_v56 = vsel %vm344_vm2, %v337_v42, %v341_v51  ;;  %v347_v57 = vsel %vm344_vm2, %v341_v51, %v337_v42 }
 0x160   : > { %582 = vmatprep.subr.bf16.mxu0 %v333_v52  ;;  %v357_v63 = vmul.f32 %v1551_v54, %v347_v57  ;;  %v358_v0 = vmul.f32 %v1554_v55, %v345_v56 }
 0x161   : > { %583 = vmatpush1.bf16.msra.mxu0 %v332_v53 }
 0x162   : > { %v343_v58 = vpop.permute.xlu1 %342  ;;  %v366_v59 = vpop.permute.xlu0 %365 }
 0x163   : > { %v346_v60 = vsel %vm344_vm2, %v339_v50, %v343_v58  ;;  %v348_v61 = vsel %vm344_vm2, %v343_v58, %v339_v50 }
 0x164   : > { %v359_v1 = vmul.f32 %v1551_v54, %v348_v61  ;;  %v360_v2 = vmul.f32 %v1554_v55, %v346_v60  ;;  %v1614_v60 = vrot.slane %v1527_v34, %v442_v48 }
 0x166   : > { %v368_v3 = vpop.permute.xlu1 %367  ;;  %v370_v6 = vpop.permute.xlu0 %369  ;;  %v362_v7 = vpack.c.bf16 %v360_v2, %v358_v0  ;;  %v361_v8 = vpack.c.bf16 %v359_v1, %v357_v63 }
 0x167   : > { %v374_v13 = vsel %vm373_vm3, %v366_v59, %v370_v6  ;;  %v376_v14 = vsel %vm373_vm3, %v370_v6, %v366_v59  ;;  %v1611_v59 = vrot.slane %v1525_v33, %v442_v48 }
 0x168   : > { %584 = vmatprep.subr.bf16.mxu0 %v362_v7  ;;  %v386_v26 = vmul.f32 %v1571_v9, %v376_v14  ;;  %v387_v27 = vmul.f32 %v1574_v12, %v374_v13 }
 0x169   : > { %585 = vmatpush1.bf16.msra.mxu0 %v361_v8 }
 0x16a   : > { %v372_v16 = vpop.permute.xlu1 %371  ;;  %v395_v17 = vpop.permute.xlu0 %394 }
 0x16b   : > { %v375_v18 = vsel %vm373_vm3, %v368_v3, %v372_v16  ;;  %v377_v19 = vsel %vm373_vm3, %v372_v16, %v368_v3  ;;  %v471_v3 = vsub.s32 6, %v1520_v29 }
 0x16c   : > { %v388_v28 = vmul.f32 %v1571_v9, %v377_v19  ;;  %v389_v30 = vmul.f32 %v1574_v12, %v375_v18 }
 0x16d   : > { %v1637_v16 = vrot.slane %v1525_v33, %v471_v3 }
 0x16e   : > { %v397_v32 = vpop.permute.xlu1 %396  ;;  %v399_v35 = vpop.permute.xlu0 %398  ;;  %v391_v36 = vpack.c.bf16 %v389_v30, %v387_v27  ;;  %v390_v39 = vpack.c.bf16 %v388_v28, %v386_v26  ;;  %v500_v26 = vsub.s32 7, %v1520_v29 }
 0x16f   : > { %v403_v42 = vsel %vm402_vm4, %v395_v17, %v399_v35  ;;  %v405_v43 = vsel %vm402_vm4, %v399_v35, %v395_v17  ;;  %v1640_v17 = vrot.slane %v1527_v34, %v471_v3 }
 0x170   : > { %586 = vmatprep.subr.bf16.mxu0 %v391_v36  ;;  %v415_v49 = vmul.f32 %v1591_v40, %v405_v43  ;;  %v416_v50 = vmul.f32 %v1594_v41, %v403_v42  ;;  %v1657_v43 = vrot.slane %v1525_v33, %v500_v26 }
 0x171   : > { %587 = vmatpush1.bf16.msra.mxu0 %v390_v39 }
 0x172   : > { %v401_v44 = vpop.permute.xlu1 %400  ;;  %v428_v45 = vpop.permute.xlu0 %427 }
 0x173   : > { %v404_v46 = vsel %vm402_vm4, %v397_v32, %v401_v44  ;;  %v406_v47 = vsel %vm402_vm4, %v401_v44, %v397_v32  ;;  %v1660_v44 = vrot.slane %v1527_v34, %v500_v26 }
 0x174   : > { %v417_v51 = vmul.f32 %v1591_v40, %v406_v47  ;;  %v418_v52 = vmul.f32 %v1594_v41, %v404_v46 }
 0x176   : > { %v430_v53 = vpop.permute.xlu1 %429  ;;  %v432_v56 = vpop.permute.xlu0 %431  ;;  %v420_v57 = vpack.c.bf16 %v418_v52, %v416_v50  ;;  %v419_v58 = vpack.c.bf16 %v417_v51, %v415_v49 }
 0x177   : > { %v436_v61 = vsel %vm435_vm5, %v428_v45, %v432_v56  ;;  %v438_v62 = vsel %vm435_vm5, %v432_v56, %v428_v45 }
 0x178   : > { %588 = vmatprep.subr.bf16.mxu0 %v420_v57  ;;  %v448_v6 = vmul.f32 %v1611_v59, %v436_v61  ;;  %v449_v7 = vmul.f32 %v1614_v60, %v438_v62  ;;  %v1677_v61 = vld [vmem:[#allocation6 + $0x18] ss:$0 sm:$0xff] }
 0x179   : > { %589 = vmatpush1.bf16.msra.mxu0 %v419_v58  ;;  %v1675_v58 = vld [vmem:[#allocation6 + $0x10] ss:$0 sm:$0xff] }
 0x17a   : > { %v434_v63 = vpop.permute.xlu1 %433  ;;  %590 = vmatprep.subr.bf16.mxu0 %v424_v24  ;;  %v457_v0 = vpop.permute.xlu0 %456 }
 0x17b   : > { %v437_v1 = vsel %vm435_vm5, %v430_v53, %v434_v63  ;;  %v439_v2 = vsel %vm435_vm5, %v434_v63, %v430_v53 }
 0x17c   : > { %v450_v8 = vmul.f32 %v1611_v59, %v437_v1  ;;  %v451_v13 = vmul.f32 %v1614_v60, %v439_v2 }
 0x17d   : > { %591 = vmatpush1.bf16.msra.mxu0 %v423_v25 }
 0x17e   : > { %v459_v21 = vpop.permute.xlu1 %458  ;;  %v461_v23 = vpop.permute.xlu0 %460  ;;  %v453_v24 = vpack.c.bf16 %v451_v13, %v449_v7  ;;  %v452_v14 = vpack.c.bf16 %v450_v8, %v448_v6 }
 0x17f   : > { %v465_v18 = vsel %vm464_vm6, %v457_v0, %v461_v23  ;;  %v467_v15 = vsel %vm464_vm6, %v461_v23, %v457_v0  ;;  %v1070_v23 = vld [vmem:[%s1963_s3] ss:$8 sps:$4 sm:$0xff]  }
 0x180   : > { %592 = vmatprep.subr.bf16.mxu0 %v453_v24  ;;  %v477_v27 = vmul.f32 %v1637_v16, %v465_v18  ;;  %v478_v28 = vmul.f32 %v1640_v17, %v467_v15 }
 0x181   : > { %593 = vmatpush1.bf16.msra.mxu0 %v452_v14 }
 0x182   : > { %v463_v22 = vpop.permute.xlu1 %462  ;;  %v486_v25 = vpop.permute.xlu0 %485 }
 0x183   : > { %v466_v19 = vsel %vm464_vm6, %v459_v21, %v463_v22  ;;  %v468_v20 = vsel %vm464_vm6, %v463_v22, %v459_v21 }
 0x184   : > { %v479_v30 = vmul.f32 %v1637_v16, %v466_v19  ;;  %v480_v32 = vmul.f32 %v1640_v17, %v468_v20 }
 0x186   : > { %v488_v35 = vpop.permute.xlu1 %487  ;;  %v490_v36 = vpop.permute.xlu0 %489  ;;  %v482_v39 = vpack.c.bf16 %v480_v32, %v478_v28  ;;  %v481_v42 = vpack.c.bf16 %v479_v30, %v477_v27 }
 0x187   : > { %v494_v29 = vsel %vm493_vm7, %v486_v25, %v490_v36  ;;  %v496_v45 = vsel %vm493_vm7, %v490_v36, %v486_v25 }
 0x188   : > { %594 = vmatprep.subr.bf16.mxu0 %v482_v39  ;;  %v506_v49 = vmul.f32 %v1657_v43, %v494_v29  ;;  %v507_v34 = vmul.f32 %v1660_v44, %v496_v45 }
 0x189   : > { %595 = vmatpush1.bf16.msra.mxu0 %v481_v42  ;;  %v1075_v42 = vld [vmem:[%s1964_s4 + $0x4] ss:$8 sps:$4 sm:$0xff]  }
 0x18a   : > { %v492_v46 = vpop.permute.xlu1 %491  ;;  %v515_v47 = vpop.permute.xlu0 %514  ;;  %985 = vmatprep.mubr.msk.bf16.mxu1 %vm578_vm0, %v1075_v42 }
 0x18b   : > { %v495_v48 = vsel %vm493_vm7, %v488_v35, %v492_v46  ;;  %v497_v33 = vsel %vm493_vm7, %v492_v46, %v488_v35 }
 0x18c   : > { %v508_v50 = vmul.f32 %v1657_v43, %v495_v48  ;;  %v509_v51 = vmul.f32 %v1660_v44, %v497_v33 }
 0x18e   : > { %v517_v52 = vpop.permute.xlu1 %516  ;;  %v519_v53 = vpop.permute.xlu0 %518  ;;  %v511_v56 = vpack.c.bf16 %v509_v51, %v507_v34  ;;  %v510_v57 = vpack.c.bf16 %v508_v50, %v506_v49 }
 0x18f   : > { %v523_v62 = vsel %vm522_vm8, %v515_v47, %v519_v53  ;;  %v525_v63 = vsel %vm522_vm8, %v519_v53, %v515_v47 }
 0x190   : > { %596 = vmatprep.subr.bf16.mxu0 %v511_v56  ;;  %v535_v3 = vmul.f32 %v1675_v58, %v523_v62  ;;  %v536_v6 = vmul.f32 %v1677_v61, %v525_v63 }
 0x191   : > { %597 = vmatpush1.bf16.msra.mxu0 %v510_v57 }
 0x192   : > { %v521_v0 = vpop.permute.xlu1 %520 }
 0x193   : > { %v524_v1 = vsel %vm522_vm8, %v517_v52, %v521_v0  ;;  %v526_v2 = vsel %vm522_vm8, %v521_v0, %v517_v52 }
 0x194   : > { %v537_v7 = vmul.f32 %v1675_v58, %v524_v1  ;;  %v538_v8 = vmul.f32 %v1677_v61, %v526_v2 }
 0x196   : > { %v540_v13 = vpack.c.bf16 %v538_v8, %v536_v6  ;;  %v539_v21 = vpack.c.bf16 %v537_v7, %v535_v3 }
 0x198   : > { %598 = vmatprep.subr.bf16.mxu0 %v540_v13 }
 0x199   : > { %599 = vmatpush1.bf16.msra.mxu0 %v539_v21 }
 0x19c   : > { %615 = vmatmul.mubr.bf16.vlgmr.msra.gmra.mrb[0].mxu0 %v1070_v23 }
 0x19f   : > { %v563_v24 = vpop.permute.xlu0 %562 }
 0x1a3   : > { %v567_v18 = vpop.permute.xlu1 %566 }
 0x26f   : > { %v616_v14 = vpop.f32.mrb[0].mxu0 }
 0x270   : > { %v617_v15 = vadd.f32 %v616_v14, %v563_v24  ;;  %v618_v22 = vpop.f32.mrb[1].mxu0 }
 0x271   : > { %v619_v25 = vadd.f32 %v618_v22, %v563_v24  ;;  %v620_v19 = vpop.f32.mrb[2].mxu0 }
 0x272   : > { %v1694_v20 = vmax.f32 %v617_v15, 0.0  ;;  %v621_v26 = vadd.f32 %v620_v19, %v567_v18  ;;  %v622_v27 = vpop.f32.mrb[3].mxu0 }
 0x273   : > { %v623_v28 = vadd.f32 %v622_v27, %v567_v18  ;;  %v1700_v32 = vmax.f32 %v619_v25, 0.0 }
 0x274   : > { %v1696_v30 = vmax.f32 %v621_v26, 0.0  ;;  %629 = vrot.lane.b32.xlu1 %v1694_v20, %s1213_s28 }
 0x275   : > { %v1702_v35 = vmax.f32 %v623_v28, 0.0 }
 0x276   : > { %631 = vrot.lane.b32.xlu0 %v1696_v30, %s1213_s28  ;;  %v709_v36 = vpack.c.bf16 %v1696_v30, %v1694_v20 }
 0x277   : > { %v710_v39 = vpack.c.bf16 %v1702_v35, %v1700_v32 }
 0x278   : > { %649 = vrot.lane.b32.xlu1 %v1694_v20, %s1214_s25 }
 0x27a   : > { %651 = vrot.lane.b32.xlu0 %v1696_v30, %s1214_s25 }
 0x27c   : > { %669 = vrot.lane.b32.xlu1 %v1694_v20, %s1215_s11 }
 0x27e   : > { %671 = vrot.lane.b32.xlu0 %v1696_v30, %s1215_s11 }
 0x280   : > { %689 = vrot.lane.b32.xlu1 %v1694_v20, %s1216_s15 }
 0x282   : > { %691 = vrot.lane.b32.xlu0 %v1696_v30, %s1216_s15 }
 0x284   : > { %713 = vrot.lane.b32.xlu1 %v1694_v20, %s1217_s9 }
 0x286   : > { %715 = vrot.lane.b32.xlu0 %v1696_v30, %s1217_s9 }
 0x288   : > { %733 = vrot.lane.b32.xlu1 %v1694_v20, %s1218_s26 }
 0x28a   : > { %735 = vrot.lane.b32.xlu0 %v1696_v30, %s1218_s26 }
 0x28c   : > { %753 = vrot.lane.b32.xlu1 %v1694_v20, %s1219_s12 }
 0x28e   : > { %755 = vrot.lane.b32.xlu0 %v1696_v30, %s1219_s12 }
 0x290   : > { %633 = vrot.lane.b32.xlu1 %v1700_v32, %s1213_s28 }
 0x292   : > { %635 = vrot.lane.b32.xlu0 %v1702_v35, %s1213_s28 }
 0x294   : > { %653 = vrot.lane.b32.xlu1 %v1700_v32, %s1214_s25 }
 0x296   : > { %655 = vrot.lane.b32.xlu0 %v1702_v35, %s1214_s25 }
 0x298   : > { %673 = vrot.lane.b32.xlu1 %v1700_v32, %s1215_s11 }
 0x29a   : > { %675 = vrot.lane.b32.xlu0 %v1702_v35, %s1215_s11 }
 0x29c   : > { %693 = vrot.lane.b32.xlu1 %v1700_v32, %s1216_s15 }
 0x29e   : > { %695 = vrot.lane.b32.xlu0 %v1702_v35, %s1216_s15  ;;  %s257_s15 = scalar_lea.vmem [#allocation8], %s975_s17 }
 0x2a0   : > { %773 = vrot.lane.b32.xlu1 %v1694_v20, %s1220_s13 }
 0x2a2   : > { %775 = vrot.lane.b32.xlu0 %v1696_v30, %s1220_s13 }
 0x2a4   : > { %717 = vrot.lane.b32.xlu1 %v1700_v32, %s1217_s9 }
 0x2a6   : > { %719 = vrot.lane.b32.xlu0 %v1702_v35, %s1217_s9  ;;  %s884_s9 = sshll.u32 %s257_s15, 4  ;;  %s1907_s9 = int_to_ptr.vmem [resolvable:$true] %s884_s9 }
 0x2a7   : > { %s1134_s23 = scalar_lea.vmem %s1907_s9, 512  ;;  %p1141_p4 = scmp.lt.s32.totalorder %s1907_s9, %s1139_s7 }
 0x2a8   : > { %737 = vrot.lane.b32.xlu1 %v1700_v32, %s1218_s26  ;;  %p1135_p8 = scmp.ne.s32.totalorder %s1907_s9, %s1134_s23  ;;  %p1142_p0 = scmp.lt.s32.totalorder %s1140_s8, %s1134_s23 }
 0x2aa   : > { %739 = vrot.lane.b32.xlu0 %v1702_v35, %s1218_s26  ;;  %s992_s26 = sshll.u32 %s1276_s22, 8  ;;  %p1136_p10 = pnand %p1135_p8, %p1985_p9 }
 0x2ab   : > { %s1914_s22 = scalar_lea.hbm %s1965_s5, %s992_s26  ;;  %p1143_p5 = por %p1142_p0, %p1141_p4 }
 0x2ac   : > { %757 = vrot.lane.b32.xlu1 %v1700_v32, %s1219_s12  ;;  %p1137_p1 = pneg %p1136_p10 }
 0x2ae   : > { %759 = vrot.lane.b32.xlu0 %v1702_v35, %s1219_s12  ;;  %p1144_p11 = pnand %p1143_p5, %p1137_p1 }
 0x2b0   : > { %777 = vrot.lane.b32.xlu1 %v1700_v32, %s1220_s13 }
 0x2b2   : > { %779 = vrot.lane.b32.xlu0 %v1702_v35, %s1220_s13  ;;  %s871_s13 = scalar_lea.sflag [#allocation5], %s1398_s16 }
 0x2e6   : > { %v630_v29 = vpop.permute.xlu1 %629 }
 0x2e8   : > { %v632_v45 = vpop.permute.xlu0 %631 }
 0x2ea   : > { %v650_v46 = vpop.permute.xlu1 %649 }
 0x2ec   : > { %v652_v47 = vpop.permute.xlu0 %651 }
 0x2ee   : > { %v670_v48 = vpop.permute.xlu1 %669 }
 0x2f0   : > { %v672_v33 = vpop.permute.xlu0 %671 }
 0x2f2   : > { %v690_v49 = vpop.permute.xlu1 %689 }
 0x2f4   : > { %v692_v34 = vpop.permute.xlu0 %691 }
 0x2f6   : > { %v1774_v50 = vpop.permute.xlu1 %713 }
 0x2f8   : > { %v1776_v51 = vpop.permute.xlu0 %715 }
 0x2fa   : > { %v1778_v52 = vpop.permute.xlu1 %733 }
 0x2fc   : > { %v1780_v53 = vpop.permute.xlu0 %735 }
 0x2fe   : > { %v1782_v56 = vpop.permute.xlu1 %753 }
 0x300   : > { %v1784_v57 = vpop.permute.xlu0 %755 }
 0x302   : > { %v634_v62 = vpop.permute.xlu1 %633 }
 0x303   : > { %v637_v63 = vsel %vm315_vm1, %v630_v29, %v634_v62  ;;  %v639_v0 = vsel %vm315_vm1, %v634_v62, %v630_v29 }
 0x304   : > { %v636_v1 = vpop.permute.xlu0 %635  ;;  %v641_v6 = vmul.f32 %v639_v0, %v1531_v37  ;;  %v642_v13 = vmul.f32 %v637_v63, %v1534_v38 }
 0x305   : > { %v638_v2 = vsel %vm315_vm1, %v632_v45, %v636_v1  ;;  %v640_v3 = vsel %vm315_vm1, %v636_v1, %v632_v45 }
 0x306   : > { %v643_v7 = vmul.f32 %v640_v3, %v1531_v37  ;;  %v654_v8 = vpop.permute.xlu1 %653  ;;  %v644_v21 = vmul.f32 %v638_v2, %v1534_v38 }
 0x307   : > { %v657_v23 = vsel %vm344_vm2, %v650_v46, %v654_v8  ;;  %v659_v24 = vsel %vm344_vm2, %v654_v8, %v650_v46 }
 0x308   : > { %v656_v14 = vpop.permute.xlu0 %655  ;;  %v646_v18 = vpack.c.bf16 %v644_v21, %v642_v13  ;;  %v645_v15 = vpack.c.bf16 %v643_v7, %v641_v6  ;;  %v661_v25 = vmul.f32 %v659_v24, %v1551_v54  ;;  %v662_v19 = vmul.f32 %v657_v23, %v1554_v55 }
 0x309   : > { %v658_v22 = vsel %vm344_vm2, %v652_v47, %v656_v14  ;;  %v660_v37 = vsel %vm344_vm2, %v656_v14, %v652_v47 }
 0x30a   : > { %v663_v38 = vmul.f32 %v660_v37, %v1551_v54  ;;  %v664_v26 = vmul.f32 %v658_v22, %v1554_v55  ;;  %823 = vmatprep.subr.bf16.mxu1 %v646_v18  ;;  %v674_v27 = vpop.permute.xlu1 %673 }
 0x30b   : > { %v677_v28 = vsel %vm373_vm3, %v670_v48, %v674_v27  ;;  %v679_v42 = vsel %vm373_vm3, %v674_v27, %v670_v48  ;;  %824 = vmatpush1.bf16.msra.mxu1 %v645_v15 }
 0x30c   : > { %v676_v29 = vpop.permute.xlu0 %675  ;;  %v666_v45 = vpack.c.bf16 %v664_v26, %v662_v19  ;;  %v665_v46 = vpack.c.bf16 %v663_v38, %v661_v25  ;;  %v681_v55 = vmul.f32 %v679_v42, %v1571_v9  ;;  %v682_v62 = vmul.f32 %v677_v28, %v1574_v12 }
 0x30d   : > { %v678_v47 = vsel %vm373_vm3, %v672_v33, %v676_v29  ;;  %v680_v54 = vsel %vm373_vm3, %v676_v29, %v672_v33 }
 0x30e   : > { %v683_v63 = vmul.f32 %v680_v54, %v1571_v9  ;;  %v684_v0 = vmul.f32 %v678_v47, %v1574_v12  ;;  %825 = vmatprep.subr.bf16.mxu1 %v666_v45  ;;  %v694_v48 = vpop.permute.xlu1 %693 }
 0x30f   : > { %v697_v1 = vsel %vm402_vm4, %v690_v49, %v694_v48  ;;  %v699_v2 = vsel %vm402_vm4, %v694_v48, %v690_v49  ;;  %826 = vmatpush1.bf16.msra.mxu1 %v665_v46 }
 0x310   : > { %v696_v3 = vpop.permute.xlu0 %695  ;;  %v686_v6 = vpack.c.bf16 %v684_v0, %v682_v62  ;;  %v685_v33 = vpack.c.bf16 %v683_v63, %v681_v55  ;;  %v701_v12 = vmul.f32 %v699_v2, %v1591_v40  ;;  %v702_v8 = vmul.f32 %v697_v1, %v1594_v41 }
 0x311   : > { %v698_v7 = vsel %vm402_vm4, %v692_v34, %v696_v3  ;;  %v700_v9 = vsel %vm402_vm4, %v696_v3, %v692_v34 }
 0x312   : > { %v703_v13 = vmul.f32 %v700_v9, %v1591_v40  ;;  %v704_v21 = vmul.f32 %v698_v7, %v1594_v41  ;;  %827 = vmatprep.subr.bf16.mxu1 %v686_v6  ;;  %v774_v49 = vpop.permute.xlu1 %773  ;;  %v1073_v9 = vld [vmem:[%s1964_s4] ss:$8 sps:$4 sm:$0xff]  }
 0x313   : > { %828 = vmatpush1.bf16.msra.mxu1 %v685_v33 }
 0x314   : > { %v776_v23 = vpop.permute.xlu0 %775  ;;  %v706_v24 = vpack.c.bf16 %v704_v21, %v702_v8  ;;  %v705_v14 = vpack.c.bf16 %v703_v13, %v701_v12 }
 0x316   : > { %829 = vmatprep.subr.bf16.mxu1 %v706_v24  ;;  %v718_v18 = vpop.permute.xlu1 %717 }
 0x317   : > { %v721_v34 = vsel %vm435_vm5, %v1774_v50, %v718_v18  ;;  %v723_v15 = vsel %vm435_vm5, %v718_v18, %v1774_v50  ;;  %830 = vmatpush1.bf16.msra.mxu1 %v705_v14 }
 0x318   : > { %v720_v40 = vpop.permute.xlu0 %719  ;;  %831 = vmatprep.subr.bf16.mxu1 %v710_v39  ;;  %v725_v37 = vmul.f32 %v721_v34, %v1611_v59  ;;  %v726_v25 = vmul.f32 %v723_v15, %v1614_v60 }
 0x319   : > { %v722_v41 = vsel %vm435_vm5, %v1776_v51, %v720_v40  ;;  %v724_v22 = vsel %vm435_vm5, %v720_v40, %v1776_v51 }
 0x31a   : > { %v727_v50 = vmul.f32 %v722_v41, %v1611_v59  ;;  %v728_v19 = vmul.f32 %v724_v22, %v1614_v60  ;;  %v738_v38 = vpop.permute.xlu1 %737 }
 0x31b   : > { %v741_v32 = vsel %vm464_vm6, %v1778_v52, %v738_v38  ;;  %v743_v35 = vsel %vm464_vm6, %v738_v38, %v1778_v52  ;;  %832 = vmatpush1.bf16.msra.mxu1 %v709_v36 }
 0x31c   : > { %v740_v39 = vpop.permute.xlu0 %739  ;;  %v730_v51 = vpack.c.bf16 %v728_v19, %v726_v25  ;;  %v729_v26 = vpack.c.bf16 %v727_v50, %v725_v37  ;;  %v745_v27 = vmul.f32 %v741_v32, %v1637_v16  ;;  %v746_v28 = vmul.f32 %v743_v35, %v1640_v17 }
 0x31d   : > { %v742_v59 = vsel %vm464_vm6, %v1780_v53, %v740_v39  ;;  %v744_v60 = vsel %vm464_vm6, %v740_v39, %v1780_v53 }
 0x31e   : > { %v747_v52 = vmul.f32 %v742_v59, %v1637_v16  ;;  %v748_v20 = vmul.f32 %v744_v60, %v1640_v17  ;;  %v758_v30 = vpop.permute.xlu1 %757  ;;  %833 = vmatprep.subr.bf16.mxu1 %v730_v51 }
 0x31f   : > { %v761_v36 = vsel %vm493_vm7, %v1782_v56, %v758_v30  ;;  %v763_v42 = vsel %vm493_vm7, %v758_v30, %v1782_v56  ;;  %834 = vmatpush1.bf16.msra.mxu1 %v729_v26 }
 0x320   : > { %v760_v53 = vpop.permute.xlu0 %759  ;;  %v750_v29 = vpack.c.bf16 %v748_v20, %v746_v28  ;;  %v749_v45 = vpack.c.bf16 %v747_v52, %v745_v27  ;;  %v765_v46 = vmul.f32 %v761_v36, %v1657_v43  ;;  %v766_v47 = vmul.f32 %v763_v42, %v1660_v44 }
 0x321   : > { %v762_v16 = vsel %vm493_vm7, %v1784_v57, %v760_v53  ;;  %v764_v17 = vsel %vm493_vm7, %v760_v53, %v1784_v57 }
 0x322   : > { %v767_v54 = vmul.f32 %v762_v16, %v1657_v43  ;;  %v768_v56 = vmul.f32 %v764_v17, %v1660_v44  ;;  %v778_v55 = vpop.permute.xlu1 %777  ;;  %835 = vmatprep.subr.bf16.mxu1 %v750_v29 }
 0x323   : > { %v781_v62 = vsel %vm522_vm8, %v774_v49, %v778_v55  ;;  %v783_v63 = vsel %vm522_vm8, %v778_v55, %v774_v49  ;;  %836 = vmatpush1.bf16.msra.mxu1 %v749_v45 }
 0x324   : > { %v780_v0 = vpop.permute.xlu0 %779  ;;  %v770_v48 = vpack.c.bf16 %v768_v56, %v766_v47  ;;  %v769_v57 = vpack.c.bf16 %v767_v54, %v765_v46  ;;  %v785_v44 = vmul.f32 %v1675_v58, %v781_v62  ;;  %v786_v2 = vmul.f32 %v1677_v61, %v783_v63 }
 0x325   : > { %v782_v1 = vsel %vm522_vm8, %v776_v23, %v780_v0  ;;  %v784_v43 = vsel %vm522_vm8, %v780_v0, %v776_v23 }
 0x326   : > { %v787_v3 = vmul.f32 %v1675_v58, %v782_v1  ;;  %v788_v6 = vmul.f32 %v1677_v61, %v784_v43  ;;  %837 = vmatprep.subr.bf16.mxu1 %v770_v48 }
 0x327   : > { %838 = vmatpush1.bf16.msra.mxu1 %v769_v57 }
 0x328   : > { %v790_v33 = vpack.c.bf16 %v788_v6, %v786_v2  ;;  %v789_v7 = vpack.c.bf16 %v787_v3, %v785_v44 }
 0x32a   : > { %839 = vmatprep.subr.bf16.mxu1 %v790_v33 }
 0x32b   : > { %840 = vmatpush1.bf16.msra.mxu1 %v789_v7 }
 0x32e   : > { %856 = vmatmul.mubr.bf16.vlgmr.msra.gmra.mrb[0].mxu1 %v1073_v9 }
 0x401   : > { %v857_v31 = vpop.f32.mrb[0].mxu1 }
 0x402   : > { %v858_v58 = vadd.f32 %v857_v31, %v1426_v4  ;;  %v859_v61 = vpop.f32.mrb[1].mxu1 }
 0x403   : > { %v860_v12 = vadd.f32 %v859_v61, %v1428_v5  ;;  %v861_v8 = vpop.f32.mrb[2].mxu1 }
 0x404   : > { %866 = vst [vmem:[%s257_s15] sm:$0xff] %v858_v58  ;;  %v862_v13 = vadd.f32 %v861_v8, %v1432_v10  ;;  %v863_v21 = vpop.f32.mrb[3].mxu1 }
 0x405   : > { %867 = vst [vmem:[%s257_s15 + $0x8] sm:$0xff] %v860_v12  ;;  %v864_v4 = vadd.f32 %v863_v21, %v1434_v11 }
 0x406   : > { %868 = vst [vmem:[%s257_s15 + $0x10] sm:$0xff] %v862_v13 }
 0x407   : > { %869 = vst [vmem:[%s257_s15 + $0x18] sm:$0xff] %v864_v4 }
 0x408   : > { %1147 = shalt.err (!%p1144_p11)
}
 0x409   : > { %s1148_s29 = scalar_lea.hbm %s1914_s22, 512  ;;  %s1152_s11 = scalar_lea.hbm %s1965_s5, 1024 }
 0x40a   : > { %p1149_p13 = scmp.ne.s32.totalorder %s1914_s22, %s1148_s29  ;;  %p1153_p12 = scmp.lt.u32.totalorder %s1914_s22, %s1965_s5 }
 0x40b   : > { %p1154_p3 = scmp.lt.u32.totalorder %s1152_s11, %s1148_s29  ;;  %p1156_p8 = scmp.lt.u32.totalorder %s1148_s29, %s1914_s22 }
 0x40c   : > { %p1150_p2 = pnand %p1149_p13, %p1985_p9 }
 0x40d   : > { %p1155_p7 = por %p1154_p3, %p1153_p12 }
 0x40e   : > { %p1151_p6 = pneg %p1150_p2 }
 0x40f   : > { %p1157_p10 = por %p1156_p8, %p1155_p7 }
 0x411   : > { %p1158_p1 = pnand %p1157_p10, %p1151_p6 }
 0x413   : > { %1161 = shalt.err (!%p1158_p1)
}
 0x414   : > { %s1223_s17 = smov 256   ;;  %s1224_s12 = smov 512  }
 0x415   : > { %999 = dma.vmem_to_hbm [thread:$0]  (%p1985_p9), %s1907_s9, 512, %s1914_s22, %s871_s13, %s1223_s17, %s1224_s12, %s1214_s25  }
 0x416 PF: > { %s899_s23 = sand.u32 1, %s1192_s18   ;;  %p1986_p4 = scmp.ne.s32.totalorder %s1974_s6, 0 }
 0x417   : > { %p1987_p0 = scmp.ge.s32.totalorder %s1204_s21, 2  ;;  %s900_s14 = scalar_lea.sflag [#allocation5], %s899_s23 }
 0x419   : > { %p1010_p5 = pnand %p1987_p0, %p1986_p4 }
 0x41b   : > { %1187 = dma.done.wait (!%p1010_p5), %s900_s14, 512  }
 0x41c   : > { %1189 = vsyncadd (!%p1010_p5), %s900_s14, 4294966784  ;;  %p19_p11 = scmp.ge.s32.totalorder %s1280_s24, 4   ;;  %s1988_s18 = smov %s1196_s19 }
 0x41d   : > { %s1989_s19 = smov %s1200_s20  ;;  %s1990_s20 = smov %s1292_s27 }
 0x41e   : > { %s1991_s21 = smov %s1280_s24  ;;  %21 = sbr.rel (!%p19_p11) target bundleno = 6 (0x6), region = 89 }
 0x425   :  { %905 = vsyncpa [#allocation4], 1 }
 0x426   :  { %907 = vsyncpa [#allocation4 + $0x1], 1 }
 0x427   :  { %908 = vsyncpa [#allocation7], 1 }
 0x428   :  { %909 = vsyncpa [#allocation5], 1 }
 0x429   :  { %911 = vsyncpa [#allocation5 + $0x1], 1 }

</bundles_post_ra>
